<compile_context>
chip_gen: v5e
topology: v5e:2x2
jax: 0.10.0
libtpu: 0.0.40
codegen_flags: <defaults>
</compile_context>

<pallas_src>
import functools

import jax
import jax.numpy as jnp
from jax import lax
from jax.experimental import pallas as pl
from jax.experimental.pallas import tpu as pltpu

EPS = 1e-8


def _semantic_loss_kernel(np_ref, pts_ref, text_ref, out_ref, *, margin, T):
    """One grid step == one instance k.

    np_ref:   SMEM (K,)        int32  per-instance valid point count
    pts_ref:  VMEM (1, P, D)          pre-gathered sampled point features
    text_ref: VMEM (T, D)      f32    pre-normalized text features (resident)
    out_ref:  VMEM (1, 8, 128) f32    row k: lane0=align_k, lane1=contrast_k,
                                      lane2=valid_k (all pre-multiplied by valid)
    """
    k = pl.program_id(0)
    P = pts_ref.shape[1]

    samp = pts_ref[0].astype(jnp.float32)                       # (P, D)
    npk = np_ref[k]                                             # int32 scalar

    # validity / counts straight from the SMEM scalar (no mask reductions)
    npk_f = jnp.full((1, 1), npk, dtype=jnp.float32)            # (1, 1)
    valid = (npk_f > 0.0).astype(jnp.float32)                   # (1, 1)
    inv_pcount = 1.0 / jnp.maximum(npk_f, 1.0)                  # (1, 1)

    pmask_row = (lax.broadcasted_iota(jnp.int32, (1, P), 1) < npk
                 ).astype(jnp.float32)                          # (1, P)

    # own (pre-normalized) text row from the already-resident buffer
    town_n = text_ref[pl.ds(k, 1), :]                           # (1, D)

    # per-point cosine similarity with own text feature (MXU contraction)
    dots = lax.dot_general(samp, town_n, (((1,), (1,)), ((), ())),
                           preferred_element_type=jnp.float32)  # (P, 1)
    inv_pnorm = lax.rsqrt(jnp.maximum(
        jnp.sum(samp * samp, axis=-1, keepdims=True), EPS * EPS))   # (P, 1)
    sims = dots * inv_pnorm                                     # (P, 1)

    # masked mean similarity via (1,P)@(P,1) on the MXU (no sublane reduce)
    pos_sim = jnp.dot(pmask_row, sims,
                      preferred_element_type=jnp.float32) * inv_pcount  # (1, 1)
    align_k = 1.0 - pos_sim                  # mean over valid points of (1 - cos)

    if T > 1:
        # masked mean feature on the MXU: (1,P) @ (P,D)
        feat_sum = jnp.dot(pmask_row, samp,
                           preferred_element_type=jnp.float32)  # (1, D)
        mean_feat = feat_sum * inv_pcount                       # (1, D)
        inv_mf = lax.rsqrt(jnp.maximum(
            jnp.sum(mean_feat * mean_feat, axis=-1, keepdims=True), EPS * EPS))
        text_n = text_ref[...]                                  # (T, D) pre-normalized
        # contract feature dim of both operands -> (T, 1); no transpose needed
        neg_dots = lax.dot_general(text_n, mean_feat, (((1,), (1,)), ((), ())),
                                   preferred_element_type=jnp.float32)  # (T, 1)
        neg_sims = neg_dots * inv_mf                            # (T, 1)
        offdiag = (lax.broadcasted_iota(jnp.int32, (T, 1), 0) != k
                   ).astype(jnp.float32)                        # exclude own text
        hinge = jnp.maximum(neg_sims - pos_sim + margin, 0.0) * offdiag
        contrast_k = jnp.sum(hinge, axis=0, keepdims=True) * (1.0 / (T - 1))  # (1,1)
    else:
        contrast_k = jnp.zeros((1, 1), jnp.float32)

    # lane-dense per-instance output row (reduced in the wrapper)
    sub = lax.broadcasted_iota(jnp.int32, (1, 8, 128), 1)
    lane = lax.broadcasted_iota(jnp.int32, (1, 8, 128), 2)
    out_ref[...] = (jnp.where((sub == 0) & (lane == 0), valid * align_k, 0.0)
                    + jnp.where((sub == 0) & (lane == 1), valid * contrast_k, 0.0)
                    + jnp.where((sub == 0) & (lane == 2), valid, 0.0)
                    ).astype(jnp.float32)


def _sample_indices(sample_key, N, K, P_alloc):
    """Vectorized replacement for torch.randperm(N)[:num_points] per instance."""
    # TODO(synk): for very large N, sample chunks of one shared permutation instead
    # of K full permutations (changes sampling distribution slightly).
    keys = jax.random.split(sample_key, K)
    perms = jax.vmap(lambda kk: jax.random.permutation(kk, N))(keys)   # (K, N)
    return perms[:, :P_alloc].astype(jnp.int32)


def semantic_alignment_loss(adapted_features, text_features, instance_info,
                            instance_masks, point_indices,
                            temperature=0.1, margin=0.2,
                            sample_key=None):
    """JAX/Pallas port of SemanticAlignmentLoss.forward."""
    del temperature, point_indices  # unused by the reference forward pass
    zero = jnp.float32(0.0)
    zeros = {'alignment_loss': zero, 'contrastive_loss': zero, 'total_loss': zero}

    if not text_features or len(text_features) == 0:
        return zeros
    text_all = jnp.asarray(text_features[0], jnp.float32)
    batch_info = instance_info[0] if instance_info else {'instance_ids': []}
    if text_all.shape[0] == 0:
        return zeros

    instance_ids = list(batch_info['instance_ids'])
    n_ids = len(instance_ids)
    if n_ids == 0:
        return zeros

    adapted = jnp.asarray(adapted_features)
    N, D = adapted.shape
    if N == 0:
        return zeros
    T = int(text_all.shape[0])
    K = min(n_ids, T)                       # reference loop breaks once i >= T
    P_budget = N // n_ids                   # per-instance point budget
    P = max(P_budget, 1)

    if sample_key is None:
        sample_key = jax.random.PRNGKey(0)

    # ---- host/XLA glue (hoisted out of the kernel) ----
    # deterministic random sampling of point rows + ONE big XLA gather
    idx = _sample_indices(sample_key, N, K, P)                         # (K, P)
    gathered = jnp.take(adapted, idx, axis=0)                          # (K, P, D)

    # pixel count per instance id via bincount (avoids the K*H*W broadcast)
    ids_py = [int(i) for i in instance_ids[:K]]
    max_id = max(ids_py)
    mask_flat = jnp.asarray(instance_masks).reshape(-1).astype(jnp.int32)
    mask_flat = jnp.where((mask_flat >= 0) & (mask_flat <= max_id),
                          mask_flat, max_id + 1)
    binc = jnp.bincount(mask_flat, length=max_id + 2)
    counts = binc[jnp.asarray(ids_py, jnp.int32)]                      # (K,)
    num_points = jnp.minimum(counts, jnp.int32(P_budget)).astype(jnp.int32)

    # pre-normalized text: hoists the step-invariant T*D norm work out of the kernel
    text_n = text_all * lax.rsqrt(jnp.maximum(
        jnp.sum(text_all * text_all, axis=-1, keepdims=True), EPS * EPS))

    # VMEM budget: point block (double-buffered) + resident text + output tile
    needed = (2 * P * D * gathered.dtype.itemsize + 2 * T * D * 4
              + 2 * 8 * 128 * 4 + (2 << 20))
    vmem_limit = int(min(max(needed, 16 * 1024 * 1024), 48 * 1024 * 1024))

    kernel = functools.partial(_semantic_loss_kernel, margin=float(margin), T=T)
    out = pl.pallas_call(
        kernel,
        out_shape=jax.ShapeDtypeStruct((K, 8, 128), jnp.float32),
        grid_spec=pltpu.PrefetchScalarGridSpec(
            num_scalar_prefetch=1,
            grid=(K,),
            in_specs=[
                pl.BlockSpec((1, P, D), lambda k, np_r: (k, 0, 0)),    # gathered pts
                pl.BlockSpec((T, D), lambda k, np_r: (0, 0)),          # resident text
            ],
            out_specs=pl.BlockSpec((1, 8, 128), lambda k, np_r: (k, 0, 0)),
        ),
        compiler_params=pltpu.CompilerParams(
            dimension_semantics=("parallel",),       # independent per-k rows
            vmem_limit_bytes=vmem_limit),
    )(num_points, gathered, text_n)

    # tiny K-row reduction on the host side
    a_sum = jnp.sum(out[:, 0, 0])
    c_sum = jnp.sum(out[:, 0, 1])
    n_valid = jnp.sum(out[:, 0, 2])
    denom = jnp.maximum(n_valid, 1.0)
    avg_align = a_sum / denom
    avg_contr = c_sum / denom
    return {'alignment_loss': avg_align,
            'contrastive_loss': avg_contr,
            'total_loss': avg_align + avg_contr}


def _reference_loss(adapted, text_all, instance_ids, masks, idx, margin):
    """Pure-JAX mirror of the PyTorch loop (using the same sampled indices)."""
    def cos(a, b):
        num = jnp.sum(a * b, axis=-1)
        den = jnp.maximum(jnp.linalg.norm(a, axis=-1) * jnp.linalg.norm(b, axis=-1),
                          EPS)
        return num / den

    N, _ = adapted.shape
    T = text_all.shape[0]
    n_ids = len(instance_ids)
    aligns, contrasts = [], []
    for i, iid in enumerate(instance_ids):
        if i >= T:
            break
        cnt = int(jnp.sum(masks == iid))
        if cnt == 0:
            continue
        npnts = min(cnt, N // n_ids)
        if npnts > 0:
            ipf = adapted[idx[i, :npnts]]
            tf = text_all[i]
            sims = cos(ipf, jnp.broadcast_to(tf, ipf.shape))
            aligns.append(jnp.mean(1.0 - sims))
            if T > 1:
                pos = jnp.mean(sims)
                others = jnp.concatenate([text_all[:i], text_all[i + 1:]], axis=0)
                mean_feat = jnp.mean(ipf, axis=0, keepdims=True)
                negs = cos(jnp.broadcast_to(mean_feat, others.shape), others)
                contrasts.append(jnp.mean(jnp.maximum(negs - pos + margin, 0.0)))
    a = jnp.mean(jnp.stack(aligns)) if aligns else jnp.float32(0.0)
    c = jnp.mean(jnp.stack(contrasts)) if contrasts else jnp.float32(0.0)
    return a, c, a + c


if __name__ == "__main__":
    key = jax.random.PRNGKey(0)
    k_feat, k_text, k_sample = jax.random.split(key, 3)

    N, D, H, W = 64, 32, 16, 16          # points, clip_dim, mask spatial
    adapted = jax.random.normal(k_feat, (N, D), jnp.float32)
    text = jax.random.normal(k_text, (4, D), jnp.float32)   # 4 instances' text feats

    # instance mask: 4 quadrants with ids 1..4
    rows = (jnp.arange(H)[:, None] >= H // 2).astype(jnp.int32)
    cols = (jnp.arange(W)[None, :] >= W // 2).astype(jnp.int32)
    instance_masks = 1 + rows * 2 + cols                      # values in {1,2,3,4}
    instance_info = [{'instance_ids': [1, 2, 3, 4]}]
    point_indices = jnp.arange(N, dtype=jnp.int32)

    out = semantic_alignment_loss(adapted, [text], instance_info,
                                  instance_masks, point_indices,
                                  temperature=0.1, margin=0.2,
                                  sample_key=k_sample)
    jax.block_until_ready(out['total_loss'])

    # sanity check vs. a pure-JAX mirror of the PyTorch loop (same sampling)
    idx = _sample_indices(k_sample, N, 4, N // 4)
    ref_a, ref_c, ref_t = _reference_loss(adapted, text, [1, 2, 3, 4],
                                          instance_masks, idx, 0.2)
    assert jnp.allclose(out['alignment_loss'], ref_a, atol=5e-4, rtol=5e-4)
    assert jnp.allclose(out['contrastive_loss'], ref_c, atol=5e-4, rtol=5e-4)
    assert jnp.allclose(out['total_loss'], ref_t, atol=5e-4, rtol=5e-4)

    print("KERNEL_OK")
</pallas_src>

<mosaic_0001>
module attributes {stable_mosaic.version = 11 : i64} {
  func.func @_semantic_loss_kernel(%arg0: i32, %arg1: memref<4xi32, #tpu.memory_space<smem>>, %arg2: memref<1x16x32xf32, #tpu.memory_space<vmem>>, %arg3: memref<4x32xf32, #tpu.memory_space<vmem>>, %arg4: memref<1x8x128xf32, #tpu.memory_space<vmem>>) attributes {dimension_semantics = [#tpu.dimension_semantics<parallel>], iteration_bounds = array<i64: 4>, scalar_prefetch = 1 : i64, scratch_operands = 0 : i64, tpu.core_type = #tpu.core_type<tc>, window_params = [{transform_indices = @transform_0, window_bounds = array<i64: 1, 16, 32>}, {pipeline_mode = #tpu.pipeline_mode<synchronous>, transform_indices = @transform_1, window_bounds = array<i64: 4, 32>}, {transform_indices = @transform_2, window_bounds = array<i64: 1, 8, 128>}]} {
    %c0 = arith.constant 0 : index
    %c0_0 = arith.constant 0 : index
    %c0_1 = arith.constant 0 : index
    %0 = vector.load %arg2[%c0, %c0_0, %c0_1] : memref<1x16x32xf32, #tpu.memory_space<vmem>>, vector<1x16x32xf32>
    %1 = vector.shape_cast %0 : vector<1x16x32xf32> to vector<16x32xf32>
    %2 = arith.index_cast %arg0 : i32 to index
    %3 = memref.load %arg1[%2] : memref<4xi32, #tpu.memory_space<smem>>
    %4 = arith.sitofp %3 : i32 to f32
    %5 = vector.broadcast %4 : f32 to vector<1x1xf32>
    %cst = arith.constant 0.000000e+00 : f32
    %6 = vector.broadcast %cst : f32 to vector<1x1xf32>
    %7 = arith.cmpf ogt, %5, %6 : vector<1x1xf32>
    %8 = arith.extui %7 : vector<1x1xi1> to vector<1x1xi32>
    %9 = arith.sitofp %8 : vector<1x1xi32> to vector<1x1xf32>
    %cst_2 = arith.constant 1.000000e+00 : f32
    %10 = vector.broadcast %cst_2 : f32 to vector<1x1xf32>
    %11 = arith.maximumf %5, %10 : vector<1x1xf32>
    %cst_3 = arith.constant 1.000000e+00 : f32
    %12 = vector.broadcast %cst_3 : f32 to vector<1x1xf32>
    %13 = arith.divf %12, %11 : vector<1x1xf32>
    %14 = tpu.iota {dimensions = array<i32: 1>} : vector<1x16xi32>
    %15 = vector.broadcast %3 : i32 to vector<1x16xi32>
    %16 = arith.cmpi slt, %14, %15 : vector<1x16xi32>
    %17 = arith.extui %16 : vector<1x16xi1> to vector<1x16xi32>
    %18 = arith.sitofp %17 : vector<1x16xi32> to vector<1x16xf32>
    %19 = arith.index_cast %arg0 : i32 to index
    %c0_4 = arith.constant 0 : index
    %20 = vector.load %arg3[%19, %c0_4] : memref<4x32xf32, #tpu.memory_space<vmem>>, vector<1x32xf32>
    %cst_5 = arith.constant dense<0.000000e+00> : vector<16x1xf32>
    %21 = tpu.matmul %1, %20, %cst_5 {dimension_numbers = #tpu.dot_dimension_numbers<[1], [1], [0], [0], [0, 0, 1, 0], [], []>} : vector<16x32xf32>, vector<1x32xf32>, vector<16x1xf32> -> vector<16x1xf32>
    %22 = arith.mulf %1, %1 : vector<16x32xf32>
    %cst_6 = arith.constant dense<0.000000e+00> : vector<16xf32>
    %23 = vector.multi_reduction <add>, %22, %cst_6 [1] : vector<16x32xf32> to vector<16xf32>
    %24 = vector.shape_cast %23 : vector<16xf32> to vector<16x1xf32>
    %cst_7 = arith.constant 1.000000e-16 : f32
    %25 = vector.broadcast %cst_7 : f32 to vector<16x1xf32>
    %26 = arith.maximumf %24, %25 : vector<16x1xf32>
    %27 = math.rsqrt %26 : vector<16x1xf32>
    %28 = arith.mulf %21, %27 : vector<16x1xf32>
    %cst_8 = arith.constant dense<0.000000e+00> : vector<1x1xf32>
    %29 = tpu.matmul %18, %28, %cst_8 {dimension_numbers = #tpu.dot_dimension_numbers<[1], [0], [0], [1], [0, 0, 1, 1], [], []>} : vector<1x16xf32>, vector<16x1xf32>, vector<1x1xf32> -> vector<1x1xf32>
    %30 = arith.mulf %29, %13 : vector<1x1xf32>
    %cst_9 = arith.constant 1.000000e+00 : f32
    %31 = vector.broadcast %cst_9 : f32 to vector<1x1xf32>
    %32 = arith.subf %31, %30 : vector<1x1xf32>
    %cst_10 = arith.constant dense<0.000000e+00> : vector<1x32xf32>
    %33 = tpu.matmul %18, %1, %cst_10 {dimension_numbers = #tpu.dot_dimension_numbers<[1], [0], [0], [1], [0, 0, 1, 1], [], []>} : vector<1x16xf32>, vector<16x32xf32>, vector<1x32xf32> -> vector<1x32xf32>
    %34 = vector.broadcast %13 : vector<1x1xf32> to vector<1x32xf32>
    %35 = arith.mulf %33, %34 : vector<1x32xf32>
    %36 = arith.mulf %35, %35 : vector<1x32xf32>
    %cst_11 = arith.constant dense<0.000000e+00> : vector<1xf32>
    %37 = vector.multi_reduction <add>, %36, %cst_11 [1] : vector<1x32xf32> to vector<1xf32>
    %38 = vector.shape_cast %37 : vector<1xf32> to vector<1x1xf32>
    %cst_12 = arith.constant 1.000000e-16 : f32
    %39 = vector.broadcast %cst_12 : f32 to vector<1x1xf32>
    %40 = arith.maximumf %38, %39 : vector<1x1xf32>
    %41 = math.rsqrt %40 : vector<1x1xf32>
    %c0_13 = arith.constant 0 : index
    %c0_14 = arith.constant 0 : index
    %42 = vector.load %arg3[%c0_13, %c0_14] : memref<4x32xf32, #tpu.memory_space<vmem>>, vector<4x32xf32>
    %cst_15 = arith.constant dense<0.000000e+00> : vector<4x1xf32>
    %43 = tpu.matmul %42, %35, %cst_15 {dimension_numbers = #tpu.dot_dimension_numbers<[1], [1], [0], [0], [0, 0, 1, 0], [], []>} : vector<4x32xf32>, vector<1x32xf32>, vector<4x1xf32> -> vector<4x1xf32>
    %44 = vector.broadcast %41 : vector<1x1xf32> to vector<4x1xf32>
    %45 = arith.mulf %43, %44 : vector<4x1xf32>
    %46 = tpu.iota {dimensions = array<i32: 0>} : vector<4x1xi32>
    %47 = vector.broadcast %arg0 : i32 to vector<4x1xi32>
    %48 = arith.cmpi ne, %46, %47 : vector<4x1xi32>
    %49 = arith.extui %48 : vector<4x1xi1> to vector<4x1xi32>
    %50 = arith.sitofp %49 : vector<4x1xi32> to vector<4x1xf32>
    %51 = vector.broadcast %30 : vector<1x1xf32> to vector<4x1xf32>
    %52 = arith.subf %45, %51 : vector<4x1xf32>
    %cst_16 = arith.constant 2.000000e-01 : f32
    %53 = vector.broadcast %cst_16 : f32 to vector<4x1xf32>
    %54 = arith.addf %52, %53 : vector<4x1xf32>
    %cst_17 = arith.constant 0.000000e+00 : f32
    %55 = vector.broadcast %cst_17 : f32 to vector<4x1xf32>
    %56 = arith.maximumf %54, %55 : vector<4x1xf32>
    %57 = arith.mulf %56, %50 : vector<4x1xf32>
    %cst_18 = arith.constant dense<0.000000e+00> : vector<1xf32>
    %58 = vector.multi_reduction <add>, %57, %cst_18 [0] : vector<4x1xf32> to vector<1xf32>
    %59 = vector.shape_cast %58 : vector<1xf32> to vector<1x1xf32>
    %cst_19 = arith.constant 0.333333343 : f32
    %60 = vector.broadcast %cst_19 : f32 to vector<1x1xf32>
    %61 = arith.mulf %59, %60 : vector<1x1xf32>
    %62 = tpu.iota {dimensions = array<i32: 1>} : vector<1x8x128xi32>
    %63 = tpu.iota {dimensions = array<i32: 2>} : vector<1x8x128xi32>
    %c0_i32 = arith.constant 0 : i32
    %64 = vector.broadcast %c0_i32 : i32 to vector<1x8x128xi32>
    %65 = arith.cmpi eq, %62, %64 : vector<1x8x128xi32>
    %c0_i32_20 = arith.constant 0 : i32
    %66 = vector.broadcast %c0_i32_20 : i32 to vector<1x8x128xi32>
    %67 = arith.cmpi eq, %63, %66 : vector<1x8x128xi32>
    %68 = arith.andi %65, %67 : vector<1x8x128xi1>
    %69 = arith.mulf %9, %32 : vector<1x1xf32>
    %cst_21 = arith.constant 0.000000e+00 : f32
    %70 = vector.shape_cast %69 : vector<1x1xf32> to vector<1x1x1xf32>
    %71 = vector.broadcast %70 : vector<1x1x1xf32> to vector<1x8x128xf32>
    %72 = vector.broadcast %cst_21 : f32 to vector<1x8x128xf32>
    %73 = arith.select %68, %71, %72 : vector<1x8x128xi1>, vector<1x8x128xf32>
    %c0_i32_22 = arith.constant 0 : i32
    %74 = vector.broadcast %c0_i32_22 : i32 to vector<1x8x128xi32>
    %75 = arith.cmpi eq, %62, %74 : vector<1x8x128xi32>
    %c1_i32 = arith.constant 1 : i32
    %76 = vector.broadcast %c1_i32 : i32 to vector<1x8x128xi32>
    %77 = arith.cmpi eq, %63, %76 : vector<1x8x128xi32>
    %78 = arith.andi %75, %77 : vector<1x8x128xi1>
    %79 = arith.mulf %9, %61 : vector<1x1xf32>
    %cst_23 = arith.constant 0.000000e+00 : f32
    %80 = vector.shape_cast %79 : vector<1x1xf32> to vector<1x1x1xf32>
    %81 = vector.broadcast %80 : vector<1x1x1xf32> to vector<1x8x128xf32>
    %82 = vector.broadcast %cst_23 : f32 to vector<1x8x128xf32>
    %83 = arith.select %78, %81, %82 : vector<1x8x128xi1>, vector<1x8x128xf32>
    %84 = arith.addf %73, %83 : vector<1x8x128xf32>
    %c0_i32_24 = arith.constant 0 : i32
    %85 = vector.broadcast %c0_i32_24 : i32 to vector<1x8x128xi32>
    %86 = arith.cmpi eq, %62, %85 : vector<1x8x128xi32>
    %c2_i32 = arith.constant 2 : i32
    %87 = vector.broadcast %c2_i32 : i32 to vector<1x8x128xi32>
    %88 = arith.cmpi eq, %63, %87 : vector<1x8x128xi32>
    %89 = arith.andi %86, %88 : vector<1x8x128xi1>
    %cst_25 = arith.constant 0.000000e+00 : f32
    %90 = vector.shape_cast %9 : vector<1x1xf32> to vector<1x1x1xf32>
    %91 = vector.broadcast %90 : vector<1x1x1xf32> to vector<1x8x128xf32>
    %92 = vector.broadcast %cst_25 : f32 to vector<1x8x128xf32>
    %93 = arith.select %89, %91, %92 : vector<1x8x128xi1>, vector<1x8x128xf32>
    %94 = arith.addf %84, %93 : vector<1x8x128xf32>
    %c0_26 = arith.constant 0 : index
    %c0_27 = arith.constant 0 : index
    %c0_28 = arith.constant 0 : index
    %95 = vector.load %arg4[%c0_26, %c0_27, %c0_28] : memref<1x8x128xf32, #tpu.memory_space<vmem>>, vector<1x8x128xf32>
    tpu.vector_store %arg4[%c0_26, %c0_27, %c0_28], %94 {strides = array<i32>} : memref<1x8x128xf32, #tpu.memory_space<vmem>>, vector<1x8x128xf32>,
    return
  }
  func.func @transform_0(%arg0: i32, %arg1: memref<4xi32, #tpu.memory_space<smem>>) -> (i32, i32, i32) {
    %c0_i32 = arith.constant 0 : i32
    %c0_i32_0 = arith.constant 0 : i32
    %c0_i32_1 = arith.constant 0 : i32
    return %arg0, %c0_i32, %c0_i32_0 : i32, i32, i32
  }
  func.func @transform_1(%arg0: i32, %arg1: memref<4xi32, #tpu.memory_space<smem>>) -> (i32, i32) {
    %c0_i32 = arith.constant 0 : i32
    %c0_i32_0 = arith.constant 0 : i32
    %c0_i32_1 = arith.constant 0 : i32
    return %c0_i32, %c0_i32_0 : i32, i32
  }
  func.func @transform_2(%arg0: i32, %arg1: memref<4xi32, #tpu.memory_space<smem>>) -> (i32, i32, i32) {
    %c0_i32 = arith.constant 0 : i32
    %c0_i32_0 = arith.constant 0 : i32
    %c0_i32_1 = arith.constant 0 : i32
    return %arg0, %c0_i32, %c0_i32_0 : i32, i32, i32
  }
}

</mosaic_0001>

<bundles_post_ra>
// kernel: tpu_custom_call.1
= control target key start
LH: loop header
LB: loop body
LE: loop exit
PB: predicated region body
PF: predicated region fallthrough
CT: control target
= control target key end

     0   :  { %s720_s15 = smov [#allocation3]   ;;  %s918_s0 = inlined_call_operand.hbm [shape: s32[4], index: 0, kind: input, shape index: {}]   ;;  %s919_s1 = inlined_call_operand.hbm [shape: f32[4,16,32], index: 1, kind: input, shape index: {}]   ;;  %s920_s2 = inlined_call_operand.hbm [shape: f32[4,32], index: 2, kind: input, shape index: {}]   ;;  %s921_s3 = inlined_call_operand.hbm [shape: f32[4,8,128], index: 3, kind: output, shape index: {}]  }
   0x1   :  { %s9_s14 = sshll.u32 %s918_s0, 4  ;;  %s10_s14 = int_to_ptr.hbm [resolvable:$true] %s9_s14 }
   0x2   :  { %12 = dma.hbm_to_smem %s10_s14, 16, %s720_s15, [#allocation2] }
   0x3   :  { %690 = dma.done.wait [#allocation2], 16 }
   0x4   :  { %691 = vsyncadd [#allocation2], 4294967280 }
   0x5   :  { %15 = sfence }
   0x6   :  { %16 = vsyncpa [#allocation5], 0 }
   0x7   :  { %18 = vsyncpa [#allocation5 + $0x1], 0 }
   0x8   :  { %19 = vsyncpa [#allocation8], 0 }
   0x9   :  { %20 = vsyncpa [#allocation6], 0 }
   0xa   :  { %22 = vsyncpa [#allocation6 + $0x1], 0  ;;  %s749_s16 = smov 0   ;;  %s751_s17 = smov 0  }
   0xb   :  { %s753_s18 = smov 0   ;;  %s755_s19 = smov 0  }
   0xc LB: > { %s770_s0 = sadd.s32 4294967295, %s718_s19   ;;  %s475_s20 = sadd.s32 4294967294, %s718_s19   ;;  %s718_s19 = sphi %s755_s19, %s931_s19   ;;  %s714_s18 = sphi %s753_s18, %s930_s18   ;;  %s710_s17 = sphi %s751_s17, %s929_s17   ;;  %s706_s16 = sphi %s749_s16, %s928_s16  }
   0xd   : > { %s774_s21 = sadd.s32 1, %s718_s19   ;;  %s35_s22 = sadd.s32 1, %s714_s18 }
   0xe   : > { %s32_s23 = ssub.s32 %s718_s19, %s774_s21  ;;  %p42_p0 = scmp.ne.s32.totalorder %s714_s18, %s710_s17 }
   0xf   : > { %p33_p1 = scmp.eq.s32.totalorder %s32_s23, 0  ;;  %p43_p2 = scmp.eq.s32.totalorder %s718_s19, 0 }
  0x10   : > { %p48_p3 = scmp.ne.s32.totalorder %s710_s17, %s706_s16  ;;  %p49_p4 = scmp.eq.s32.totalorder %s770_s0, 0 }
  0x11   : > { %s786_s24 = scalar_select %p33_p1, %s714_s18, %s35_s22  }
  0x12   : > { %p788_p5 = por %p43_p2, %p42_p0  ;;  %p794_p6 = por %p49_p4, %p48_p3 }
  0x13   : > { %p93_p7 = scmp.eq.s32.totalorder %s770_s0, 3  ;;  %p99_p8 = scmp.eq.s32.totalorder %s475_s20, 3 }
  0x14   : > { %p476_p9 = scmp.ge.s32.totalorder %s718_s19, 1  ;;  %p106_p10 = scmp.lt.s32.totalorder %s718_s19, 5 }
  0x15   : > { %p801_p11 = por %p93_p7, %p42_p0  ;;  %p805_p12 = por %p99_p8, %p48_p3 }
  0x16   : > { %p809_p13 = pnand %p476_p9, %p106_p10  ;;  %s118_s5 = sshll.u32 %s920_s2, 4  ;;  %s119_s5 = int_to_ptr.hbm [resolvable:$true] %s118_s5 }
  0x17   : > { %s721_s6 = smov [#allocation7]   ;;  %p523_p2 = scmp.lt.s32.totalorder %s718_s19, 4 }
  0x18   : > { %p510_p1 = pneg %p809_p13  ;;  %s120_s7 = sshll.u32 %s721_s6, 4  ;;  %s121_s7 = int_to_ptr.vmem [resolvable:$true] %s120_s7 }
  0x19   : > { %s131_s8 = sand.u32 1, %s714_s18   ;;  %p824_p3 = pnand %p523_p2, %p788_p5 }
  0x1a   : > { %p511_p0 = pnand %p510_p1, %p49_p4  ;;  %s479_s10 = sshll.u32 %s131_s8, 4 }
  0x1b   : > { %s496_s11 = sshll.u32 %s718_s19, 4  ;;  %s135_s20 = scalar_lea.vmem [#allocation4], %s479_s10 }
  0x1c   : > { %513 = dma.hbm_to_vmem [thread:$0]  (!%p511_p0), %s119_s5, 64, %s121_s7, [#allocation8]  }
  0x1d   : > { %s140_s14 = scalar_lea.hbm %s919_s1, %s496_s11  ;;  %s143_s22 = sshll.u32 %s135_s20, 4  ;;  %s144_s22 = int_to_ptr.vmem [resolvable:$true] %s143_s22 }
  0x1e   : > { %s141_s15 = sshll.u32 %s140_s14, 4  ;;  %s132_s23 = scalar_lea.sflag [#allocation5], %s131_s8  ;;  %s142_s15 = int_to_ptr.hbm [resolvable:$true] %s141_s15 }
  0x1f   : > { %s616_s30 = sshra.s32 %s142_s15, 4  ;;  %p620_p7 = pneg %p824_p3  ;;  %s617_s30 = int_to_ptr.hbm [resolvable:$true] %s616_s30 }
  0x20   : > { %s618_s25 = scalar_lea.hbm %s617_s30, 16  ;;  %s623_s6 = scalar_lea.hbm %s919_s1, 64 }
  0x21   : > { %p619_p5 = scmp.ne.s32.totalorder %s617_s30, %s618_s25  ;;  %p624_p10 = scmp.lt.s32.totalorder %s617_s30, %s919_s1 }
  0x22   : > { %p625_p1 = scmp.lt.s32.totalorder %s623_s6, %s618_s25 }
  0x23   : > { %p621_p8 = pnand %p620_p7, %p619_p5 }
  0x24   : > { %p626_p0 = por %p625_p1, %p624_p10 }
  0x25   : > { %p622_p9 = pneg %p621_p8 }
  0x27   : > { %p627_p2 = pnand %p626_p0, %p622_p9 }
  0x29   : > { %630 = shalt.err (!%p627_p2)
}
  0x2a   : > { %s722_s8 = smov 128   ;;  %s723_s10 = smov 8  }
  0x2b   : > { %517 = dma.hbm_to_vmem [thread:$0]  (!%p824_p3), %s142_s15, 256, %s144_s22, %s132_s23, %s722_s8, %s722_s8, %s723_s10  }
  0x2c   : > { %155 = sbr.rel (%p809_p13) target bundleno = 481 (0x1e1), region = 28  ;;  %s845_s12 = sand.u32 (!%p809_p13), 1, %s710_s17  }
  0x2d   : > { %s483_s13 = sshll.u32 (!%p809_p13), %s845_s12, 4  ;;  %s158_s14 = scalar_lea.sflag (!%p809_p13), [#allocation5], %s845_s12 }
  0x2e   : > { %s161_s20 = scalar_lea.vmem (!%p809_p13), [#allocation4], %s483_s13 }
  0x31   : > { %693 = dma.done.wait (%p794_p6), %s158_s14, 256  }
  0x32   : > { %695 = vsyncadd (%p794_p6), %s158_s14, 4294967040 }
  0x33   : > { %697 = dma.done.wait (%p49_p4), [#allocation8], 64  }
  0x34   : > { %699 = vsyncadd (%p49_p4), [#allocation8], 4294967232  ;;  %v212_v0 = vlaneseq  ;;  %s190_s29 = sld [smem:[#allocation3 + %s770_s0]]  ;;  %v189_v2 = vld [vmem:[%s161_s20 + $0x8] sm:$0xff]  ;;  %v188_v3 = vld [vmem:[%s161_s20] sm:$0xff]  ;;  %vm223_vm0 = vcmask 261120  }
  0x35   : > { %s497_s9 = scalar_lea.vmem [#allocation7], %s718_s19  ;;  %302 = vmatpush.msra.mxu1 %v189_v2  ;;  %v231_v5 = vmul.f32 %v189_v2, %v189_v2  ;;  %vm262_vm2 = vcmask 130048   ;;  %v724_v7 = vmov 0.0   ;;  %v230_v11 = vmul.f32 %v188_v3, %v188_v3  ;;  %v325_v40 = vld [vmem:[#allocation7] sm:$0xf]  ;;  %s485_s15 = sshll.u32 %s845_s12, 3 }
  0x36   : > { %v859_v1 = vand.u32 127, %v212_v0  ;;  %v565_v6 = vld [vmem:[%s497_s9 - $0x1] ss:$0 sm:$0xff]  ;;  %vm310_vm7 = vcmask 253952   ;;  %vm328_vm10 = vcmask 257024   ;;  %v725_v61 = vmov 0  }
  0x37   : > { %303 = vmatpush.msra.mxu1 %v188_v3  ;;  %v235_v9 = vsel %vm223_vm0, %v231_v5, 0.0  ;;  %v222_v10 = vmul.f32 %v565_v6, %v189_v2  ;;  %v221_v13 = vmul.f32 %v565_v6, %v188_v3  ;;  %v232_v14 = vsel %vm223_vm0, %v230_v11, 0.0  ;;  %564 = vset.pattern.permute.xlu0 %v725_v61  ;;  %s493_s23 = sshll.u32 %s770_s0, 3  ;;  %s187_s5 = scalar_lea.vmem [#allocation9], %s485_s15 }
  0x38   : > { %236 = vadd.xlane.f32.xlu0 %v235_v9  ;;  %v335_v9 = vshrl.u32 %v212_v0, 7  ;;  %v336_v11 = vstv %s770_s0  ;;  %s389_s4 = scalar_lea.hbm %s921_s3, %s493_s23  ;;  %s391_s6 = sshll.u32 %s187_s5, 4  ;;  %s392_s6 = int_to_ptr.vmem [resolvable:$true] %s391_s6 }
  0x39   : > { %v227_v12 = vsel %vm223_vm0, %v222_v10, 0.0  ;;  %v224_v15 = vsel %vm223_vm0, %v221_v13, 0.0  ;;  %s393_s7 = sshll.u32 %s389_s4, 4  ;;  %s379_s0 = scalar_lea.sflag [#allocation6], %s845_s12  ;;  %s394_s7 = int_to_ptr.hbm [resolvable:$true] %s393_s7 }
  0x3a   : > { %v214_v4 = vstv %s190_s29  ;;  %228 = vadd.xlane.f32.xlu1 %v227_v12  ;;  %s191_s26 = scvt.s32.f32 %s190_s29  ;;  %s660_s11 = sshra.s32 %s394_s7, 4  ;;  %s661_s11 = int_to_ptr.hbm [resolvable:$true] %s660_s11 }
  0x3b   : > { %vm215_vm1 = vcmp.lt.s32.totalorder %v859_v1, %v214_v4  ;;  %s662_s8 = scalar_lea.hbm %s661_s11, 8  ;;  %s666_s14 = scalar_lea.hbm %s921_s3, 32 }
  0x3c   : > { %v864_v8 = vsel %vm215_vm1, 1.0, %v724_v7  ;;  %v872_v16 = vstv %s191_s26  ;;  %p663_p4 = scmp.ne.s32.totalorder %s661_s11, %s662_s8  ;;  %p667_p3 = scmp.lt.s32.totalorder %s661_s11, %s921_s3 }
  0x3d   : > { %490 = vmatmul.msk.f32.vlgmr.msra.gmra.mxu1 %vm262_vm2, %v864_v8  ;;  %v196_v17 = vmax.f32 %v872_v16, 1.0  ;;  %p668_p5 = scmp.lt.s32.totalorder %s666_s14, %s662_s8 }
  0x3e   : > { %p664_p6 = pnand %p663_p4, %p801_p11 }
  0x3f   : > { %566 = vrcp.f32 %v196_v17  ;;  %vm202_vm3 = vweird.f32 %v196_v17  ;;  %v208_v23 = vand.u32 2147483648, %v196_v17  ;;  %v206_v26 = vand.u32 2147483647, %v196_v17  ;;  %p669_p7 = por %p668_p5, %p667_p3 }
  0x40   : > { %233 = vadd.xlane.f32.xlu0 %v232_v14  ;;  %p665_p13 = pneg %p664_p6 }
  0x41   : > { %v209_v27 = vor.u32 1.1754944e-38, %v208_v23  ;;  %vm207_vm6 = vcmp.eq.f32.partialorder %v206_v26, 8.507059e+37 }
  0x42   : > { %225 = vadd.xlane.f32.xlu1 %v224_v15  ;;  %p670_p8 = pnand %p669_p7, %p665_p13 }
  0x45   : > { %v567_v18 = vpop.eup %566 }
  0x46   : > { %v198_v19 = vmul.f32 %v567_v18, %v196_v17  ;;  %vm203_vm4 = vweird.f32 %v567_v18 }
  0x47   : > { %vm204_vm5 = vmor %vm202_vm3, %vm203_vm4  ;;  %vm193_vm3 = vcmp.gt.f32.partialorder %v872_v16, 0.0  ;;  %vm345_vm4 = vcmask 3072  }
  0x48   : > { %v199_v20 = vsub.f32 1.0, %v198_v19  ;;  %v486_v13 = vsel %vm193_vm3, 1.0, %v724_v7 }
  0x4a   : > { %v200_v21 = vmul.f32 %v567_v18, %v199_v20 }
  0x4c   : > { %v201_v25 = vadd.f32 %v567_v18, %v200_v21 }
  0x4e   : > { %v205_v28 = vsel %vm204_vm5, %v567_v18, %v201_v25  ;;  %vm354_vm5 = vcmp.eq.s32.totalorder %v335_v9, 0 }
  0x4f   : > { %v210_v30 = vsel %vm207_vm6, %v209_v27, %v205_v28  ;;  %vm355_vm6 = vcmp.eq.s32.totalorder %v859_v1, 0 }
  0xab   : > { %v237_v22 = vpop.xlane.xlu0 %236 }
  0xac   : > { %v239_v24 = vmax.f32 %v237_v22, 1e-16 }
  0xad   : > { %v229_v42 = vpop.xlane.xlu1 %228 }
  0xae   : > { %568 = vrsqrt.f32 %v239_v24  ;;  %vm256_vm9 = vweird.f32 %v239_v24 }
  0xb3   : > { %v234_v29 = vpop.xlane.xlu0 %233 }
  0xb4   : > { %v569_v31 = vpop.eup %568  ;;  %v238_v32 = vmax.f32 %v234_v29, 1e-16 }
  0xb5   : > { %v251_v33 = vmul.f32 %v569_v31, %v239_v24  ;;  %vm257_vm8 = vweird.f32 %v569_v31  ;;  %v226_v55 = vpop.xlane.xlu1 %225 }
  0xb6   : > { %570 = vrsqrt.f32 %v238_v32  ;;  %vm258_vm11 = vmor %vm256_vm9, %vm257_vm8  ;;  %vm246_vm13 = vweird.f32 %v238_v32  ;;  %vm373_vm8 = vcmp.eq.s32.totalorder %v859_v1, 2 }
  0xb7   : > { %v252_v36 = vmul.f32 %v569_v31, %v251_v33  ;;  %vm356_vm9 = vmand %vm354_vm5, %vm355_vm6 }
  0xb9   : > { %v253_v39 = vmul.f32 0.5, %v252_v36 }
  0xba   : > { %v305_v34 = vpop.f32.mrf.mxu1 }
  0xbb   : > { %v308_v35 = vmul.f32 %v305_v34, %v210_v30  ;;  %v254_v43 = vsub.f32 1.5, %v253_v39 }
  0xbc   : > { %v571_v44 = vpop.eup %570 }
  0xbd   : > { %v326_v37 = vperm.slane %v308_v35, 0  ;;  %v309_v38 = vmul.f32 %v308_v35, %v308_v35  ;;  %v241_v46 = vmul.f32 %v571_v44, %v238_v32  ;;  %v255_v47 = vmul.f32 %v569_v31, %v254_v43 }
  0xbe   : > { %vm247_vm12 = vweird.f32 %v571_v44 }
  0xbf   : > { %v311_v41 = vsel %vm310_vm7, %v309_v38, 0.0  ;;  %v327_v45 = vmul.f32 %v326_v37, %v325_v40  ;;  %v242_v48 = vmul.f32 %v571_v44, %v241_v46  ;;  %v259_v49 = vsel %vm258_vm11, %v569_v31, %v255_v47  ;;  %vm248_vm14 = vmor %vm246_vm13, %vm247_vm12 }
  0xc0   : > { %312 = vadd.xlane.f32.xlu2 %v311_v41  ;;  %v261_v50 = vmul.f32 %v259_v49, %v229_v42  ;;  %vm363_vm7 = vcmp.eq.s32.totalorder %v859_v1, 1  ;;  %vm374_vm11 = vmand %vm354_vm5, %vm373_vm8 }
  0xc1   : > { %v329_v51 = vsel %vm328_vm10, %v327_v45, 0.0  ;;  %v243_v52 = vmul.f32 0.5, %v242_v48  ;;  %vm364_vm10 = vmand %vm354_vm5, %vm363_vm7  ;;  %v375_v33 = vsel %vm374_vm11, %v486_v13, 0.0 }
  0xc2   : > { %280 = vmatpush.msra.mxu0 %v261_v50 }
  0xc3   : > { %v244_v53 = vsub.f32 1.5, %v243_v52 }
  0xc5   : > { %v245_v54 = vmul.f32 %v571_v44, %v244_v53 }
  0xc7   : > { %v249_v56 = vsel %vm248_vm14, %v571_v44, %v245_v54 }
  0xc8   : > { %330 = vadd.xlane.f32.xlu2 %v329_v51  ;;  %v260_v57 = vmul.f32 %v249_v56, %v226_v55 }
  0xca   : > { %281 = vmatpush.msra.mxu0 %v260_v57 }
  0xcb   : > { %489 = vmatmul.msk.f32.vlgmr.msra.gmra.mxu0 %vm262_vm2, %v864_v8  ;;  %vm337_vm2 = vcmp.ne.s32.totalorder %v335_v9, %v336_v11 }
  0xcc   : > { %v491_v21 = vsel %vm337_vm2, 1.0, %v724_v7 }
 0x133   : > { %v313_v58 = vpop.xlane.xlu2 %312 }
 0x134   : > { %v314_v59 = vmax.f32 %v313_v58, 1e-16 }
 0x136   : > { %572 = vrsqrt.f32 %v314_v59  ;;  %vm321_vm15 = vweird.f32 %v314_v59 }
 0x13b   : > { %v331_v12 = vpop.xlane.xlu2 %330 }
 0x13c   : > { %v573_v60 = vpop.eup %572 }
 0x13d   : > { %v316_v62 = vmul.f32 %v573_v60, %v314_v59  ;;  %vm322_vm0 = vweird.f32 %v573_v60 }
 0x13e   : > { %vm323_vm1 = vmor %vm321_vm15, %vm322_vm0 }
 0x13f   : > { %v317_v63 = vmul.f32 %v573_v60, %v316_v62 }
 0x141   : > { %v318_v2 = vmul.f32 0.5, %v317_v63 }
 0x143   : > { %v319_v3 = vsub.f32 1.5, %v318_v2 }
 0x145   : > { %v320_v4 = vmul.f32 %v573_v60, %v319_v3 }
 0x147   : > { %v324_v5 = vsel %vm323_vm1, %v573_v60, %v320_v4 }
 0x148   : > { %v332_v6 = vperm.slane %v324_v5, 0  ;;  %v283_v8 = vpop.f32.mrf.mxu0 }
 0x149   : > { %v286_v10 = vmul.f32 %v283_v8, %v210_v30 }
 0x14a   : > { %v333_v14 = vmul.f32 %v332_v6, %v331_v12 }
 0x14b   : > { %v340_v15 = vperm.slane %v286_v10, 0  ;;  %v287_v17 = vsub.f32 1.0, %v286_v10 }
 0x14d   : > { %v341_v18 = vsub.f32 %v333_v14, %v340_v15  ;;  %v357_v19 = vmul.f32 %v486_v13, %v287_v17 }
 0x14f   : > { %v342_v20 = vadd.f32 0.2, %v341_v18  ;;  %500 = vpush %v357_v19 }
 0x151   : > { %v343_v22 = vmax.f32 %v342_v20, 0.0 }
 0x153   : > { %v344_v16 = vmul.f32 %v491_v21, %v343_v22 }
 0x155   : > { %v346_v0 = vsel %vm345_vm4, %v344_v16, 0.0 }
 0x156   : > { %v347_v23 = vrot.slane %v346_v0, 4 }
 0x158   : > { %v348_v24 = vadd.f32 %v347_v23, %v346_v0 }
 0x15a   : > { %v349_v25 = vrot.slane %v348_v24, 2 }
 0x15c   : > { %v350_v26 = vadd.f32 %v349_v25, %v348_v24 }
 0x15e   : > { %v351_v27 = vrot.slane %v350_v26, 1 }
 0x160   : > { %v352_v28 = vadd.f32 %v351_v27, %v350_v26 }
 0x162   : > { %v353_v29 = vmul.f32 0.33333334, %v352_v28 }
 0x164   : > { %v365_v30 = vmul.f32 %v486_v13, %v353_v29 }
 0x166   : > { %368 = vperm.xlu0 %564, %v365_v30  }
 0x180   : > { %s501_s22 = spop %500 }
 0x181   : > { %v360_v7 = vstv %s501_s22 }
 0x182   : > { %v362_v32 = vsel %vm356_vm9, %v360_v7, 0.0 }
 0x1d8   : > { %v369_v31 = vpop.permute.xlu0 %368 }
 0x1d9   : > { %v371_v34 = vsel %vm364_vm10, %v369_v31, 0.0 }
 0x1da   : > { %v372_v35 = vadd.f32 %v371_v34, %v362_v32 }
 0x1dc   : > { %v376_v1 = vadd.f32 %v375_v33, %v372_v35 }
 0x1de   : > { %377 = vst [vmem:[%s187_s5] sm:$0xff] %v376_v1 }
 0x1df   : > { %673 = shalt.err (!%p670_p8)
}
 0x1e0   : > { %508 = dma.vmem_to_hbm [thread:$0]  (%p801_p11), %s392_s6, 128, %s394_s7, %s379_s0  }
 0x1e1 PF: > { %p525_p9 = scmp.ge.s32.totalorder %s718_s19, 2  ;;  %s405_s12 = sand.u32 1, %s706_s16  }
 0x1e2   : > { %s406_s9 = scalar_lea.sflag [#allocation6], %s405_s12 }
 0x1e3   : > { %p519_p10 = pnand %p525_p9, %p805_p12 }
 0x1e5   : > { %p520_p1 = pneg %p519_p10 }
 0x1e7   : > { %701 = dma.done.wait (%p520_p1), %s406_s9, 128  }
 0x1e8   : > { %703 = vsyncadd (%p520_p1), %s406_s9, 4294967168  ;;  %p25_p0 = scmp.ge.s32.totalorder %s774_s21, 6   ;;  %s928_s16 = smov %s710_s17 }
 0x1e9   : > { %s929_s17 = smov %s714_s18  ;;  %s930_s18 = smov %s786_s24 }
 0x1ea   : > { %s931_s19 = smov %s774_s21  ;;  %27 = sbr.rel (!%p25_p0) target bundleno = 12 (0xc), region = 78 }
 0x1ef   :  { %412 = vsyncpa [#allocation5], 1 }
 0x1f0   :  { %414 = vsyncpa [#allocation5 + $0x1], 1 }
 0x1f1   :  { %415 = vsyncpa [#allocation8], 1 }
 0x1f2   :  { %416 = vsyncpa [#allocation6], 1 }
 0x1f3   :  { %418 = vsyncpa [#allocation6 + $0x1], 1 }

</bundles_post_ra>
